<compile_context>
chip_gen: v7x
topology: tpu7x:2x2x1
jax: 0.10.0
libtpu: 0.0.40
codegen_flags: <defaults>
</compile_context>

<pallas_src>
import functools

import jax
import jax.numpy as jnp
from jax import lax
from jax.experimental import pallas as pl
from jax.experimental.pallas import tpu as pltpu

LANES = 128
SUBLANES = 8
STRIP_ROWS = 64                        # (64,128) f32 strip = 8 vregs per input
TARGET_BLOCK_BYTES = 8 * 1024 * 1024   # HBM bytes per grid step, both inputs combined


def _cdiv(a, b):
    return -(-a // b)


def _round_up(a, b):
    return _cdiv(a, b) * b


@functools.lru_cache(maxsize=1)
def _device_kind():
    try:
        return jax.devices()[0].device_kind.lower()
    except Exception:  # pragma: no cover - CPU/interpret fallback
        return ""


def _is_v7x():
    kind = _device_kind()
    return ("v7" in kind) or ("7x" in kind)


def _has_bf16_vpu():
    kind = _device_kind()
    return ("v6" in kind) or _is_v7x()


def _make_dice_kernel(rows, block_rows, total_blocks, steps, mask_start,
                      mask_ever_needed, elementwise_dtype):
    """All non-kernel args are Python ints/bools/dtypes baked at trace time."""
    assert block_rows % SUBLANES == 0
    n_full = block_rows // STRIP_ROWS
    tail = block_rows - n_full * STRIP_ROWS
    assert tail % SUBLANES == 0

    def fold(x_f32):
        # (nrows, 128) f32 -> (8, 128) with pure VPU adds (sublane grouping is
        # exactly the native (8,128) tiling, so the reshape is layout-free).
        nrows = x_f32.shape[0]
        return jnp.sum(x_f32.reshape(nrows // SUBLANES, SUBLANES, LANES), axis=0)

    def kernel(p_ref, t_ref, out_ref):
        i = pl.program_id(1)

        @pl.when(i == 0)
        def _():
            out_ref[...] = jnp.zeros_like(out_ref)

        linear_blk = pl.program_id(0) * steps + i

        def strip_sums(start_row, nrows, masked):
            p = p_ref[pl.ds(start_row, nrows), :].astype(elementwise_dtype)
            t = t_ref[pl.ds(start_row, nrows), :].astype(elementwise_dtype)
            if masked:
                # Mask (a) rows past the end of the array inside a ragged last
                # block and (b) fully duplicated blocks on the extra shard
                # step.  Applied before any multiply/add.
                blk = jnp.minimum(linear_blk, total_blocks - 1)
                row_ids = (blk * block_rows + start_row
                           + lax.broadcasted_iota(jnp.int32, (nrows, 1), 0))
                valid = (row_ids < rows) & (linear_blk < total_blocks)
                p = jnp.where(valid, p, 0)
                t = jnp.where(valid, t, 0)
            inter = fold((p * t).astype(jnp.float32))
            denom = fold((p + t).astype(jnp.float32))
            return inter, denom

        def accumulate(masked):
            init = (jnp.zeros((SUBLANES, LANES), jnp.float32),
                    jnp.zeros((SUBLANES, LANES), jnp.float32))
            if n_full > 0:
                def body(k, carry):
                    ia, da = carry
                    start = pl.multiple_of(k * STRIP_ROWS, STRIP_ROWS)
                    si, sd = strip_sums(start, STRIP_ROWS, masked)
                    return ia + si, da + sd

                unroll = n_full if n_full <= 8 else 8
                ia, da = lax.fori_loop(0, n_full, body, init, unroll=unroll)
            else:
                ia, da = init
            if tail > 0:
                si, sd = strip_sums(n_full * STRIP_ROWS, tail, masked)
                ia, da = ia + si, da + sd
            out_ref[0, 0:SUBLANES, :] += ia
            out_ref[0, SUBLANES:2 * SUBLANES, :] += da

        if not mask_ever_needed:
            accumulate(masked=False)
        else:
            needs_mask = linear_blk >= mask_start

            @pl.when(jnp.logical_not(needs_mask))
            def _():
                accumulate(masked=False)

            @pl.when(needs_mask)
            def _():
                accumulate(masked=True)

    return kernel


def dice_loss(pred, target, smooth=1.0, _max_block_rows=None):
    assert pred.shape == target.shape
    p = pred.reshape(-1)
    t = target.reshape(-1)
    # Keep native floating dtypes (bf16 stays bf16 in HBM); only promote
    # non-float inputs.
    if not jnp.issubdtype(p.dtype, jnp.floating):
        p = p.astype(jnp.float32)
    if not jnp.issubdtype(t.dtype, jnp.floating):
        t = t.astype(jnp.float32)

    n = p.shape[0]
    # TODO(synk): for large non-1024-aligned tensors this jnp.pad is a full HBM
    # copy; a pad-free path would need manual-DMA / 1-D block handling.
    padded = _round_up(max(n, 1), SUBLANES * LANES)
    if padded != n:
        p = jnp.pad(p, (0, padded - n))
        t = jnp.pad(t, (0, padded - n))
    rows = padded // LANES
    p = p.reshape(rows, LANES)
    t = t.reshape(rows, LANES)

    # Dtype-scaled block size: ~8 MiB of input traffic per grid step
    # (8192 rows for f32/f32, 16384 for bf16/bf16).
    bytes_per_row = LANES * (p.dtype.itemsize + t.dtype.itemsize)
    max_rows = max(SUBLANES,
                   (TARGET_BLOCK_BYTES // bytes_per_row) // STRIP_ROWS * STRIP_ROWS)
    if _max_block_rows is not None:
        max_rows = max(SUBLANES, (_max_block_rows // SUBLANES) * SUBLANES)
    block_rows = min(max_rows, rows)

    # Shard the row range across the two TensorCores only on v7x.
    num_shards = 2 if _is_v7x() else 1
    total_blocks = _cdiv(rows, block_rows)
    steps = _cdiv(total_blocks, num_shards)

    last_block_partial = (rows % block_rows) != 0
    has_dup_blocks = num_shards * steps > total_blocks
    mask_ever_needed = last_block_partial or has_dup_blocks
    mask_start = total_blocks - 1 if last_block_partial else total_blocks

    use_bf16_elementwise = (p.dtype == jnp.bfloat16 and t.dtype == jnp.bfloat16
                            and _has_bf16_vpu())
    elementwise_dtype = jnp.bfloat16 if use_bf16_elementwise else jnp.float32

    kernel = _make_dice_kernel(rows, block_rows, total_blocks, steps,
                               mask_start, mask_ever_needed, elementwise_dtype)

    def in_index_map(c, i):
        # Clamp so the DMA stays in-bounds on duplicated shard steps; the
        # kernel masks those blocks to zero.
        return (jnp.minimum(c * steps + i, total_blocks - 1), 0)

    if num_shards == 2:
        shard_sem = getattr(pltpu, "CORE_PARALLEL", "parallel")
    else:
        shard_sem = "arbitrary"

    # VMEM: 2 inputs x 2 pipeline buffers x block bytes + output/headroom.
    block_bytes = block_rows * bytes_per_row
    vmem_limit = int(min(max(2 * block_bytes + (6 << 20), 16 << 20), 48 << 20))

    partials = pl.pallas_call(
        kernel,
        out_shape=jax.ShapeDtypeStruct((num_shards, 2 * SUBLANES, LANES),
                                       jnp.float32),
        grid_spec=pltpu.PrefetchScalarGridSpec(
            num_scalar_prefetch=0,
            grid=(num_shards, steps),
            in_specs=[
                pl.BlockSpec((block_rows, LANES), in_index_map),
                pl.BlockSpec((block_rows, LANES), in_index_map),
            ],
            out_specs=pl.BlockSpec((1, 2 * SUBLANES, LANES),
                                   lambda c, i: (c, 0, 0)),
        ),
        compiler_params=pltpu.CompilerParams(
            dimension_semantics=(shard_sem, "arbitrary"),
            vmem_limit_bytes=vmem_limit,
        ),
    )(p, t)

    # Tiny epilogue: combine per-core (8,128) vector partials into the scalar
    # loss (a few thousand elements, negligible).
    intersection = jnp.sum(partials[:, :SUBLANES, :])
    denominator = jnp.sum(partials[:, SUBLANES:, :])
    dice_score = (2.0 * intersection + smooth) / (denominator + smooth)
    return 1.0 - dice_score


if __name__ == "__main__":
    key = jax.random.PRNGKey(0)
    k1, k2 = jax.random.split(key)

    # Segmentation-style NCHW inputs [2, 4, 16, 16].
    pred = jax.nn.sigmoid(jax.random.normal(k1, (2, 4, 16, 16), jnp.float32))
    target = (jax.random.uniform(k2, (2, 4, 16, 16)) > 0.5).astype(jnp.float32)

    loss = dice_loss(pred, target, smooth=1.0)
    jax.block_until_ready(loss)

    inter = jnp.sum(pred * target)
    denom = jnp.sum(pred) + jnp.sum(target)
    ref = 1.0 - (2.0 * inter + 1.0) / (denom + 1.0)
    assert jnp.allclose(loss, ref, atol=1e-5, rtol=1e-5), (loss, ref)

    # Non-lane-aligned shape exercises the tail-pad path.
    k3, k4 = jax.random.split(k2)
    pred2 = jax.nn.sigmoid(jax.random.normal(k3, (3, 5, 7), jnp.float32))
    target2 = (jax.random.uniform(k4, (3, 5, 7)) > 0.5).astype(jnp.float32)
    loss2 = dice_loss(pred2, target2, smooth=1.0)
    jax.block_until_ready(loss2)
    inter2 = jnp.sum(pred2 * target2)
    denom2 = jnp.sum(pred2) + jnp.sum(target2)
    ref2 = 1.0 - (2.0 * inter2 + 1.0) / (denom2 + 1.0)
    assert jnp.allclose(loss2, ref2, atol=1e-5, rtol=1e-5), (loss2, ref2)

    # Forced small block exercises the multi-block accumulation and the
    # pl.when-gated masked (ragged last block) path on a tiny input.
    k5, k6 = jax.random.split(k4)
    pred3 = jax.nn.sigmoid(jax.random.normal(k5, (2, 4, 16, 24), jnp.float32))
    target3 = (jax.random.uniform(k6, (2, 4, 16, 24)) > 0.5).astype(jnp.float32)
    loss3 = dice_loss(pred3, target3, smooth=1.0, _max_block_rows=16)
    jax.block_until_ready(loss3)
    inter3 = jnp.sum(pred3 * target3)
    denom3 = jnp.sum(pred3) + jnp.sum(target3)
    ref3 = 1.0 - (2.0 * inter3 + 1.0) / (denom3 + 1.0)
    assert jnp.allclose(loss3, ref3, atol=1e-5, rtol=1e-5), (loss3, ref3)

    print("KERNEL_OK")
</pallas_src>

<mosaic_0001>
module attributes {stable_mosaic.version = 11 : i64} {
  func.func @kernel(%arg0: i32, %arg1: i32, %arg2: memref<16x128xf32, #tpu.memory_space<vmem>>, %arg3: memref<16x128xf32, #tpu.memory_space<vmem>>, %arg4: memref<1x16x128xf32, #tpu.memory_space<vmem>>) attributes {dimension_semantics = [#tpu.dimension_semantics<arbitrary>, #tpu.dimension_semantics<arbitrary>], iteration_bounds = array<i64: 1, 1>, scalar_prefetch = 0 : i64, scratch_operands = 0 : i64, tpu.core_type = #tpu.core_type<tc>, window_params = [{transform_indices = @transform_0, window_bounds = array<i64: 16, 128>}, {transform_indices = @transform_1, window_bounds = array<i64: 16, 128>}, {transform_indices = @transform_2, window_bounds = array<i64: 1, 16, 128>}]} {
    %c0_i32 = arith.constant 0 : i32
    %0 = arith.cmpi eq, %arg1, %c0_i32 : i32
    %1 = arith.extui %0 : i1 to i32
    %c0_i32_0 = arith.constant 0 : i32
    %2 = arith.cmpi ne, %1, %c0_i32_0 : i32
    scf.if %2 {
      %cst_18 = arith.constant 0.000000e+00 : f32
      %27 = vector.broadcast %cst_18 : f32 to vector<1x16x128xf32>
      %c0_19 = arith.constant 0 : index
      %c0_20 = arith.constant 0 : index
      %c0_21 = arith.constant 0 : index
      %28 = vector.load %arg4[%c0_19, %c0_20, %c0_21] : memref<1x16x128xf32, #tpu.memory_space<vmem>>, vector<1x16x128xf32>
      tpu.vector_store %arg4[%c0_19, %c0_20, %c0_21], %27 {strides = array<i32>} : memref<1x16x128xf32, #tpu.memory_space<vmem>>, vector<1x16x128xf32>,
    } else {
    }
    %cst = arith.constant 0.000000e+00 : f32
    %3 = vector.broadcast %cst : f32 to vector<8x128xf32>
    %cst_1 = arith.constant 0.000000e+00 : f32
    %4 = vector.broadcast %cst_1 : f32 to vector<8x128xf32>
    %c0 = arith.constant 0 : index
    %c0_2 = arith.constant 0 : index
    %5 = vector.load %arg2[%c0, %c0_2] : memref<16x128xf32, #tpu.memory_space<vmem>>, vector<16x128xf32>
    %c0_3 = arith.constant 0 : index
    %c0_4 = arith.constant 0 : index
    %6 = vector.load %arg3[%c0_3, %c0_4] : memref<16x128xf32, #tpu.memory_space<vmem>>, vector<16x128xf32>
    %7 = arith.mulf %5, %6 : vector<16x128xf32>
    %8 = vector.shape_cast %7 : vector<16x128xf32> to vector<2x8x128xf32>
    %cst_5 = arith.constant dense<0.000000e+00> : vector<8x128xf32>
    %9 = vector.multi_reduction <add>, %8, %cst_5 [0] : vector<2x8x128xf32> to vector<8x128xf32>
    %10 = arith.addf %5, %6 : vector<16x128xf32>
    %11 = vector.shape_cast %10 : vector<16x128xf32> to vector<2x8x128xf32>
    %cst_6 = arith.constant dense<0.000000e+00> : vector<8x128xf32>
    %12 = vector.multi_reduction <add>, %11, %cst_6 [0] : vector<2x8x128xf32> to vector<8x128xf32>
    %13 = arith.addf %3, %9 : vector<8x128xf32>
    %14 = arith.addf %4, %12 : vector<8x128xf32>
    %c0_7 = arith.constant 0 : index
    %c0_8 = arith.constant 0 : index
    %c0_9 = arith.constant 0 : index
    %15 = vector.load %arg4[%c0_7, %c0_8, %c0_9] : memref<1x16x128xf32, #tpu.memory_space<vmem>>, vector<1x8x128xf32>
    %16 = vector.shape_cast %15 : vector<1x8x128xf32> to vector<8x128xf32>
    %17 = arith.addf %16, %13 : vector<8x128xf32>
    %c0_10 = arith.constant 0 : index
    %c0_11 = arith.constant 0 : index
    %c0_12 = arith.constant 0 : index
    %18 = vector.load %arg4[%c0_10, %c0_11, %c0_12] : memref<1x16x128xf32, #tpu.memory_space<vmem>>, vector<1x8x128xf32>
    %19 = vector.shape_cast %18 : vector<1x8x128xf32> to vector<8x128xf32>
    %20 = vector.shape_cast %17 : vector<8x128xf32> to vector<1x8x128xf32>
    tpu.vector_store %arg4[%c0_10, %c0_11, %c0_12], %20 {strides = array<i32>} : memref<1x16x128xf32, #tpu.memory_space<vmem>>, vector<1x8x128xf32>,
    %c0_13 = arith.constant 0 : index
    %c8 = arith.constant 8 : index
    %c0_14 = arith.constant 0 : index
    %21 = vector.load %arg4[%c0_13, %c8, %c0_14] : memref<1x16x128xf32, #tpu.memory_space<vmem>>, vector<1x8x128xf32>
    %22 = vector.shape_cast %21 : vector<1x8x128xf32> to vector<8x128xf32>
    %23 = arith.addf %22, %14 : vector<8x128xf32>
    %c0_15 = arith.constant 0 : index
    %c8_16 = arith.constant 8 : index
    %c0_17 = arith.constant 0 : index
    %24 = vector.load %arg4[%c0_15, %c8_16, %c0_17] : memref<1x16x128xf32, #tpu.memory_space<vmem>>, vector<1x8x128xf32>
    %25 = vector.shape_cast %24 : vector<1x8x128xf32> to vector<8x128xf32>
    %26 = vector.shape_cast %23 : vector<8x128xf32> to vector<1x8x128xf32>
    tpu.vector_store %arg4[%c0_15, %c8_16, %c0_17], %26 {strides = array<i32>} : memref<1x16x128xf32, #tpu.memory_space<vmem>>, vector<1x8x128xf32>,
    return
  }
  func.func @transform_0(%arg0: i32, %arg1: i32) -> (i32, i32) {
    %c1_i32 = arith.constant 1 : i32
    %0 = arith.muli %arg0, %c1_i32 : i32
    %1 = arith.addi %0, %arg1 : i32
    %c0_i32 = arith.constant 0 : i32
    %2 = arith.minsi %1, %c0_i32 : i32
    %c0_i32_0 = arith.constant 0 : i32
    %c0_i32_1 = arith.constant 0 : i32
    return %2, %c0_i32_0 : i32, i32
  }
  func.func @transform_1(%arg0: i32, %arg1: i32) -> (i32, i32) {
    %c1_i32 = arith.constant 1 : i32
    %0 = arith.muli %arg0, %c1_i32 : i32
    %1 = arith.addi %0, %arg1 : i32
    %c0_i32 = arith.constant 0 : i32
    %2 = arith.minsi %1, %c0_i32 : i32
    %c0_i32_0 = arith.constant 0 : i32
    %c0_i32_1 = arith.constant 0 : i32
    return %2, %c0_i32_0 : i32, i32
  }
  func.func @transform_2(%arg0: i32, %arg1: i32) -> (i32, i32, i32) {
    %c0_i32 = arith.constant 0 : i32
    %c0_i32_0 = arith.constant 0 : i32
    %c0_i32_1 = arith.constant 0 : i32
    return %arg0, %c0_i32, %c0_i32_0 : i32, i32, i32
  }
}

</mosaic_0001>

<bundles_post_ra>
// kernel: tpu_custom_call.1
= control target key start
LH: loop header
LB: loop body
LE: loop exit
PB: predicated region body
PF: predicated region fallthrough
CT: control target
= control target key end

     0   :  { %7 = vsyncpa [#allocation3], 0  ;;  %s249_s0 = inlined_call_operand.hbm [shape: f32[16,128], index: 0, kind: input, shape index: {}]   ;;  %s250_s1 = inlined_call_operand.hbm [shape: f32[16,128], index: 1, kind: input, shape index: {}]   ;;  %s251_s2 = inlined_call_operand.hbm [shape: f32[1,16,128], index: 2, kind: output, shape index: {}]  }
   0x1   :  { %8 = vsyncpa [#allocation6], 0 }
   0x2   :  { %9 = vsyncpa [#allocation4], 0  ;;  %s184_s9 = smov [#allocation2]   ;;  %s112_s13 = scalar_lea.hbm %s249_s0, 256 }
   0x3   :  { %s21_s10 = sshll.u32 %s184_s9, 4  ;;  %p113_p0 = scmp.ne.s32.totalorder %s249_s0, %s112_s13  ;;  %s22_s10 = int_to_ptr.vmem [resolvable:$true] %s21_s10 }
   0x4   :  { %p116_p1 = scmp.lt.u32.totalorder %s112_s13, %s249_s0 }
   0x6   :  { %p118_p2 = pnand %p116_p1, %p113_p0 }
   0x8   :  { %121 = shalt.err (!%p118_p2)
}
   0x9   :  { %s122_s18 = scalar_lea.vmem %s22_s10, 256  ;;  %p127_p4 = scmp.lt.s32.totalorder %s22_s10, %s22_s10 }
   0xa   :  { %p123_p3 = scmp.ne.s32.totalorder %s22_s10, %s122_s18  ;;  %p128_p5 = scmp.lt.s32.totalorder %s122_s18, %s122_s18 }
   0xc   :  { %p129_p6 = por %p128_p5, %p127_p4 }
   0xe   :  { %p130_p7 = pnand %p129_p6, %p123_p3 }
  0x10   :  { %133 = shalt.err (!%p130_p7)
}
  0x11   :  { %s185_s19 = smov 128   ;;  %s186_s20 = smov 8  }
  0x12   :  { %27 = dma.hbm_to_vmem [thread:$0]  %s249_s0, 256, %s22_s10, [#allocation3], %s185_s19, %s185_s19, %s186_s20  }
  0x13   :  { %s187_s23 = smov [#allocation5]   ;;  %s134_s27 = scalar_lea.hbm %s250_s1, 256 }
  0x14   :  { %s39_s24 = sshll.u32 %s187_s23, 4  ;;  %p135_p8 = scmp.ne.s32.totalorder %s250_s1, %s134_s27  ;;  %s40_s24 = int_to_ptr.vmem [resolvable:$true] %s39_s24 }
  0x15   :  { %p138_p9 = scmp.lt.u32.totalorder %s134_s27, %s250_s1 }
  0x17   :  { %p140_p10 = pnand %p138_p9, %p135_p8 }
  0x19   :  { %143 = shalt.err (!%p140_p10)
}
  0x1a   :  { %s144_s4 = scalar_lea.vmem %s40_s24, 256  ;;  %p149_p12 = scmp.lt.s32.totalorder %s40_s24, %s40_s24 }
  0x1b   :  { %p145_p11 = scmp.ne.s32.totalorder %s40_s24, %s144_s4  ;;  %p150_p13 = scmp.lt.s32.totalorder %s144_s4, %s144_s4 }
  0x1d   :  { %p151_p0 = por %p150_p13, %p149_p12 }
  0x1f   :  { %p152_p1 = pnand %p151_p0, %p145_p11 }
  0x21   :  { %155 = shalt.err (!%p152_p1)
}
  0x22   :  { %45 = dma.hbm_to_vmem [thread:$0]  %s250_s1, 256, %s40_s24, [#allocation6], %s185_s19, %s185_s19, %s186_s20  }
  0x23   :  { %178 = dma.done.wait [#allocation3], 256  }
  0x24   :  { %179 = vsyncadd [#allocation3], 4294967040 }
  0x25   :  { %180 = dma.done.wait [#allocation6], 256  }
  0x26   :  { %181 = vsyncadd [#allocation6], 4294967040  ;;  %v66_v0 = vld [vmem:[#allocation2] sm:$0xff]  ;;  %v67_v1 = vld [vmem:[#allocation2 + $0x8] sm:$0xff]  ;;  %s188_s6 = smov [#allocation7]  }
  0x27   :  { %v68_v2 = vld [vmem:[#allocation5] sm:$0xff]  ;;  %v69_v3 = vld [vmem:[#allocation5 + $0x8] sm:$0xff]  ;;  %s89_s7 = sshll.u32 %s188_s6, 4  ;;  %s90_s7 = int_to_ptr.vmem [resolvable:$true] %s89_s7 }
  0x28   :  { %v70_v4 = vmul.f32 %v68_v2, %v66_v0  ;;  %v73_v5 = vadd.f32 %v68_v2, %v66_v0  ;;  %v71_v6 = vmul.f32 %v69_v3, %v67_v1  ;;  %v74_v7 = vadd.f32 %v69_v3, %v67_v1  ;;  %s156_s1 = scalar_lea.vmem %s90_s7, 256  ;;  %p161_p3 = scmp.lt.s32.totalorder %s90_s7, %s90_s7 }
  0x29   :  { %p157_p2 = scmp.ne.s32.totalorder %s90_s7, %s156_s1  ;;  %p162_p4 = scmp.lt.s32.totalorder %s156_s1, %s156_s1 }
  0x2a   :  { %v72_v8 = vadd.f32 %v71_v6, %v70_v4  ;;  %v75_v9 = vadd.f32 %v74_v7, %v73_v5 }
  0x2b   :  { %p163_p5 = por %p162_p4, %p161_p3 }
  0x2c   :  { %80 = vst [vmem:[#allocation7] sm:$0xff] %v72_v8  ;;  %83 = vst [vmem:[#allocation7 + $0x8] sm:$0xff] %v75_v9 }
  0x2d   :  { %p164_p6 = pnand %p163_p5, %p157_p2 }
  0x2f   :  { %167 = shalt.err (!%p164_p6)
}
  0x30   :  { %s168_s10 = scalar_lea.hbm %s251_s2, 256 }
  0x31   :  { %p169_p7 = scmp.ne.s32.totalorder %s251_s2, %s168_s10  ;;  %p172_p8 = scmp.lt.u32.totalorder %s168_s10, %s251_s2 }
  0x33   :  { %p174_p9 = pnand %p172_p8, %p169_p7 }
  0x35   :  { %177 = shalt.err (!%p174_p9)
}
  0x36   :  { %95 = dma.vmem_to_hbm [thread:$0]  %s90_s7, 256, %s251_s2, [#allocation4], %s185_s19, %s185_s19, %s186_s20  }
  0x37   :  { %182 = dma.done.wait [#allocation4], 256  }
  0x38   :  { %183 = vsyncadd [#allocation4], 4294967040 }
  0x39   :  { %99 = vsyncpa [#allocation3], 1 }
  0x3a   :  { %100 = vsyncpa [#allocation6], 1 }
  0x3b   :  { %101 = vsyncpa [#allocation4], 1 }

</bundles_post_ra>
